<compile_context>
chip_gen: v7x
topology: tpu7x:2x2x1
jax: 0.10.0
libtpu: 0.0.40
codegen_flags: <defaults>
</compile_context>

<pallas_src>
import functools

import jax
import jax.numpy as jnp
from jax.experimental import pallas as pl
from jax.experimental.pallas import tpu as pltpu


def clip_embedding_kernel(ids_ref, emb_hbm, pos_ref, o_ref, stage, sem, *,
                          t_chunk, tokens_per_batch):
    """One grid step = one (batch b, token-chunk t) tile of T_CHUNK rows.

    ids_ref : (B*T,) int32, SMEM (scalar prefetch)
    emb_hbm : (V, E)  f32, HBM (pl.ANY) -- row-gathered via DMA
    pos_ref : (T_CHUNK, E) f32 VMEM tile (same tile re-used for every batch)
    o_ref   : (T_CHUNK, E) f32 VMEM output tile
    stage   : (T_CHUNK, E) f32 VMEM scratch (DMA landing buffer)
    sem     : (T_CHUNK,) DMA semaphores
    """
    b = pl.program_id(0)
    t = pl.program_id(1)
    base = b * tokens_per_batch + t * t_chunk

    # Issue all row-gather DMAs first so the DMA engine can overlap them,
    # then wait on each (scalar id reads happen before any wait).
    for r in range(t_chunk):
        tok = ids_ref[base + r]
        pltpu.make_async_copy(emb_hbm.at[pl.ds(tok, 1), :],
                              stage.at[pl.ds(r, 1), :],
                              sem.at[r]).start()
    for r in range(t_chunk):
        pltpu.make_async_copy(emb_hbm.at[pl.ds(0, 1), :],
                              stage.at[pl.ds(r, 1), :],
                              sem.at[r]).wait()

    o_ref[...] = stage[...] + pos_ref[...]


def clip_embedding_forward(ids, emb, pos, *, t_chunk=None):
    """ids: (B, T) int | emb: (V, E) | pos: (T, E)  ->  (B, T, E)."""
    B, T = ids.shape
    V, E = emb.shape
    if t_chunk is None:
        # Largest divisor of T that is <= 16: amortizes per-step grid overhead
        # while keeping the staging buffer tiny (works for toy T=8 and CLIP T=77).
        t_chunk = max(d for d in range(1, min(T, 16) + 1) if T % d == 0)
    assert T % t_chunk == 0, "token length must be divisible by t_chunk"
    num_t = T // t_chunk

    # PyTorch nn.Embedding errors on out-of-range ids; clamp so the HBM row
    # DMA can never go out of bounds.
    ids_flat = jnp.clip(ids.reshape(-1), 0, V - 1).astype(jnp.int32)

    kern = functools.partial(clip_embedding_kernel, t_chunk=t_chunk,
                             tokens_per_batch=T)

    grid_spec = pltpu.PrefetchScalarGridSpec(
        num_scalar_prefetch=1,
        grid=(B, num_t),
        in_specs=[
            # Embedding table: stays in HBM, rows DMA'd on demand.
            pl.BlockSpec(memory_space=pl.ANY),
            # Positional embedding: same (t_chunk, E) tile for every batch.
            pl.BlockSpec((t_chunk, E), lambda b, t, ids_ref: (t, 0)),
        ],
        out_specs=pl.BlockSpec((t_chunk, E),
                               lambda b, t, ids_ref: (b * num_t + t, 0)),
        scratch_shapes=[
            pltpu.VMEM((t_chunk, E), jnp.float32),
            pltpu.SemaphoreType.DMA((t_chunk,)),
        ],
    )

    out2d = pl.pallas_call(
        kern,
        out_shape=jax.ShapeDtypeStruct((B * T, E), jnp.float32),
        grid_spec=grid_spec,
        compiler_params=pltpu.CompilerParams(
            dimension_semantics=("parallel", "parallel")),
    )(ids_flat, emb.astype(jnp.float32), pos.astype(jnp.float32))
    return out2d.reshape(B, T, E)


def clip_embedding_reference(ids, emb, pos):
    return jnp.take(emb, ids, axis=0) + pos[None, :, :]


if __name__ == "__main__":
    cfg = dict(vocab=100, n_emb=32, token=8)
    batch = 2

    key = jax.random.PRNGKey(0)
    k_ids, k_emb, k_pos = jax.random.split(key, 3)
    ids = jax.random.randint(k_ids, (batch, cfg['token']), 0, cfg['vocab'],
                             dtype=jnp.int32)
    emb = (0.02 * jax.random.normal(k_emb, (cfg['vocab'], cfg['n_emb']))
           ).astype(jnp.float32)
    # nn.Parameter(torch.zeros(...)) in the module; random here so the add is
    # actually exercised.
    pos = (0.02 * jax.random.normal(k_pos, (cfg['token'], cfg['n_emb']))
           ).astype(jnp.float32)

    out = jax.block_until_ready(clip_embedding_forward(ids, emb, pos))
    ref = jax.block_until_ready(clip_embedding_reference(ids, emb, pos))

    assert out.shape == (batch, cfg['token'], cfg['n_emb'])
    assert jnp.allclose(out, ref, rtol=1e-5, atol=1e-5), "kernel/reference mismatch"

    print("KERNEL_OK")
</pallas_src>

<mosaic_0001>
module attributes {stable_mosaic.version = 11 : i64} {
  func.func @clip_embedding_kernel(%arg0: i32, %arg1: i32, %arg2: memref<16xi32, #tpu.memory_space<smem>>, %arg3: memref<100x32xf32, #tpu.memory_space<any>>, %arg4: memref<8x32xf32, #tpu.memory_space<vmem>>, %arg5: memref<8x32xf32, #tpu.memory_space<vmem>>, %arg6: memref<8x32xf32, #tpu.memory_space<vmem>>, %arg7: memref<8x!tpu.dma_semaphore, #tpu.memory_space<semaphore_mem>>) attributes {dimension_semantics = [#tpu.dimension_semantics<parallel>, #tpu.dimension_semantics<parallel>], iteration_bounds = array<i64: 2, 1>, scalar_prefetch = 1 : i64, scratch_operands = 2 : i64, tpu.core_type = #tpu.core_type<tc>, window_params = [{}, {transform_indices = @transform_1, window_bounds = array<i64: 8, 32>}, {transform_indices = @transform_2, window_bounds = array<i64: 8, 32>}]} {
    %c8_i32 = arith.constant 8 : i32
    %0 = arith.muli %arg0, %c8_i32 : i32
    %c8_i32_0 = arith.constant 8 : i32
    %1 = arith.muli %arg1, %c8_i32_0 : i32
    %2 = arith.addi %0, %1 : i32
    %c0_i32 = arith.constant 0 : i32
    %3 = arith.addi %2, %c0_i32 : i32
    %4 = arith.index_cast %3 : i32 to index
    %5 = memref.load %arg2[%4] : memref<16xi32, #tpu.memory_space<smem>>
    %c0_i32_1 = arith.constant 0 : i32
    %c0_i32_2 = arith.constant 0 : i32
    %6 = tpu.memref_slice %arg3[%5, %c0_i32_2] : memref<100x32xf32, #tpu.memory_space<any>> -> memref<1x32xf32, #tpu.memory_space<any>>
    %c0_i32_3 = arith.constant 0 : i32
    %c0_i32_4 = arith.constant 0 : i32
    %7 = tpu.memref_slice %arg6[%c0_i32_3, %c0_i32_4] : memref<8x32xf32, #tpu.memory_space<vmem>> -> memref<1x32xf32, #tpu.memory_space<vmem>>
    %8 = tpu.memref_slice %arg7[%c0_i32_1] : memref<8x!tpu.dma_semaphore, #tpu.memory_space<semaphore_mem>> -> memref<1x!tpu.dma_semaphore, #tpu.memory_space<semaphore_mem>>
    %9 = tpu.memref_squeeze %8 : memref<1x!tpu.dma_semaphore, #tpu.memory_space<semaphore_mem>> -> memref<!tpu.dma_semaphore, #tpu.memory_space<semaphore_mem>>
    tpu.enqueue_dma source(%6 : memref<1x32xf32, #tpu.memory_space<any>>) target(%7 : memref<1x32xf32, #tpu.memory_space<vmem>>) target_semaphore(%9 : memref<!tpu.dma_semaphore, #tpu.memory_space<semaphore_mem>>)
    %c1_i32 = arith.constant 1 : i32
    %10 = arith.addi %2, %c1_i32 : i32
    %11 = arith.index_cast %10 : i32 to index
    %12 = memref.load %arg2[%11] : memref<16xi32, #tpu.memory_space<smem>>
    %c1_i32_5 = arith.constant 1 : i32
    %c0_i32_6 = arith.constant 0 : i32
    %13 = tpu.memref_slice %arg3[%12, %c0_i32_6] : memref<100x32xf32, #tpu.memory_space<any>> -> memref<1x32xf32, #tpu.memory_space<any>>
    %c1_i32_7 = arith.constant 1 : i32
    %c0_i32_8 = arith.constant 0 : i32
    %14 = tpu.memref_slice %arg6[%c1_i32_7, %c0_i32_8] : memref<8x32xf32, #tpu.memory_space<vmem>> -> memref<1x32xf32, #tpu.memory_space<vmem>>
    %15 = tpu.memref_slice %arg7[%c1_i32_5] : memref<8x!tpu.dma_semaphore, #tpu.memory_space<semaphore_mem>> -> memref<1x!tpu.dma_semaphore, #tpu.memory_space<semaphore_mem>>
    %16 = tpu.memref_squeeze %15 : memref<1x!tpu.dma_semaphore, #tpu.memory_space<semaphore_mem>> -> memref<!tpu.dma_semaphore, #tpu.memory_space<semaphore_mem>>
    tpu.enqueue_dma source(%13 : memref<1x32xf32, #tpu.memory_space<any>>) target(%14 : memref<1x32xf32, #tpu.memory_space<vmem>>) target_semaphore(%16 : memref<!tpu.dma_semaphore, #tpu.memory_space<semaphore_mem>>)
    %c2_i32 = arith.constant 2 : i32
    %17 = arith.addi %2, %c2_i32 : i32
    %18 = arith.index_cast %17 : i32 to index
    %19 = memref.load %arg2[%18] : memref<16xi32, #tpu.memory_space<smem>>
    %c2_i32_9 = arith.constant 2 : i32
    %c0_i32_10 = arith.constant 0 : i32
    %20 = tpu.memref_slice %arg3[%19, %c0_i32_10] : memref<100x32xf32, #tpu.memory_space<any>> -> memref<1x32xf32, #tpu.memory_space<any>>
    %c2_i32_11 = arith.constant 2 : i32
    %c0_i32_12 = arith.constant 0 : i32
    %21 = tpu.memref_slice %arg6[%c2_i32_11, %c0_i32_12] : memref<8x32xf32, #tpu.memory_space<vmem>> -> memref<1x32xf32, #tpu.memory_space<vmem>>
    %22 = tpu.memref_slice %arg7[%c2_i32_9] : memref<8x!tpu.dma_semaphore, #tpu.memory_space<semaphore_mem>> -> memref<1x!tpu.dma_semaphore, #tpu.memory_space<semaphore_mem>>
    %23 = tpu.memref_squeeze %22 : memref<1x!tpu.dma_semaphore, #tpu.memory_space<semaphore_mem>> -> memref<!tpu.dma_semaphore, #tpu.memory_space<semaphore_mem>>
    tpu.enqueue_dma source(%20 : memref<1x32xf32, #tpu.memory_space<any>>) target(%21 : memref<1x32xf32, #tpu.memory_space<vmem>>) target_semaphore(%23 : memref<!tpu.dma_semaphore, #tpu.memory_space<semaphore_mem>>)
    %c3_i32 = arith.constant 3 : i32
    %24 = arith.addi %2, %c3_i32 : i32
    %25 = arith.index_cast %24 : i32 to index
    %26 = memref.load %arg2[%25] : memref<16xi32, #tpu.memory_space<smem>>
    %c3_i32_13 = arith.constant 3 : i32
    %c0_i32_14 = arith.constant 0 : i32
    %27 = tpu.memref_slice %arg3[%26, %c0_i32_14] : memref<100x32xf32, #tpu.memory_space<any>> -> memref<1x32xf32, #tpu.memory_space<any>>
    %c3_i32_15 = arith.constant 3 : i32
    %c0_i32_16 = arith.constant 0 : i32
    %28 = tpu.memref_slice %arg6[%c3_i32_15, %c0_i32_16] : memref<8x32xf32, #tpu.memory_space<vmem>> -> memref<1x32xf32, #tpu.memory_space<vmem>>
    %29 = tpu.memref_slice %arg7[%c3_i32_13] : memref<8x!tpu.dma_semaphore, #tpu.memory_space<semaphore_mem>> -> memref<1x!tpu.dma_semaphore, #tpu.memory_space<semaphore_mem>>
    %30 = tpu.memref_squeeze %29 : memref<1x!tpu.dma_semaphore, #tpu.memory_space<semaphore_mem>> -> memref<!tpu.dma_semaphore, #tpu.memory_space<semaphore_mem>>
    tpu.enqueue_dma source(%27 : memref<1x32xf32, #tpu.memory_space<any>>) target(%28 : memref<1x32xf32, #tpu.memory_space<vmem>>) target_semaphore(%30 : memref<!tpu.dma_semaphore, #tpu.memory_space<semaphore_mem>>)
    %c4_i32 = arith.constant 4 : i32
    %31 = arith.addi %2, %c4_i32 : i32
    %32 = arith.index_cast %31 : i32 to index
    %33 = memref.load %arg2[%32] : memref<16xi32, #tpu.memory_space<smem>>
    %c4_i32_17 = arith.constant 4 : i32
    %c0_i32_18 = arith.constant 0 : i32
    %34 = tpu.memref_slice %arg3[%33, %c0_i32_18] : memref<100x32xf32, #tpu.memory_space<any>> -> memref<1x32xf32, #tpu.memory_space<any>>
    %c4_i32_19 = arith.constant 4 : i32
    %c0_i32_20 = arith.constant 0 : i32
    %35 = tpu.memref_slice %arg6[%c4_i32_19, %c0_i32_20] : memref<8x32xf32, #tpu.memory_space<vmem>> -> memref<1x32xf32, #tpu.memory_space<vmem>>
    %36 = tpu.memref_slice %arg7[%c4_i32_17] : memref<8x!tpu.dma_semaphore, #tpu.memory_space<semaphore_mem>> -> memref<1x!tpu.dma_semaphore, #tpu.memory_space<semaphore_mem>>
    %37 = tpu.memref_squeeze %36 : memref<1x!tpu.dma_semaphore, #tpu.memory_space<semaphore_mem>> -> memref<!tpu.dma_semaphore, #tpu.memory_space<semaphore_mem>>
    tpu.enqueue_dma source(%34 : memref<1x32xf32, #tpu.memory_space<any>>) target(%35 : memref<1x32xf32, #tpu.memory_space<vmem>>) target_semaphore(%37 : memref<!tpu.dma_semaphore, #tpu.memory_space<semaphore_mem>>)
    %c5_i32 = arith.constant 5 : i32
    %38 = arith.addi %2, %c5_i32 : i32
    %39 = arith.index_cast %38 : i32 to index
    %40 = memref.load %arg2[%39] : memref<16xi32, #tpu.memory_space<smem>>
    %c5_i32_21 = arith.constant 5 : i32
    %c0_i32_22 = arith.constant 0 : i32
    %41 = tpu.memref_slice %arg3[%40, %c0_i32_22] : memref<100x32xf32, #tpu.memory_space<any>> -> memref<1x32xf32, #tpu.memory_space<any>>
    %c5_i32_23 = arith.constant 5 : i32
    %c0_i32_24 = arith.constant 0 : i32
    %42 = tpu.memref_slice %arg6[%c5_i32_23, %c0_i32_24] : memref<8x32xf32, #tpu.memory_space<vmem>> -> memref<1x32xf32, #tpu.memory_space<vmem>>
    %43 = tpu.memref_slice %arg7[%c5_i32_21] : memref<8x!tpu.dma_semaphore, #tpu.memory_space<semaphore_mem>> -> memref<1x!tpu.dma_semaphore, #tpu.memory_space<semaphore_mem>>
    %44 = tpu.memref_squeeze %43 : memref<1x!tpu.dma_semaphore, #tpu.memory_space<semaphore_mem>> -> memref<!tpu.dma_semaphore, #tpu.memory_space<semaphore_mem>>
    tpu.enqueue_dma source(%41 : memref<1x32xf32, #tpu.memory_space<any>>) target(%42 : memref<1x32xf32, #tpu.memory_space<vmem>>) target_semaphore(%44 : memref<!tpu.dma_semaphore, #tpu.memory_space<semaphore_mem>>)
    %c6_i32 = arith.constant 6 : i32
    %45 = arith.addi %2, %c6_i32 : i32
    %46 = arith.index_cast %45 : i32 to index
    %47 = memref.load %arg2[%46] : memref<16xi32, #tpu.memory_space<smem>>
    %c6_i32_25 = arith.constant 6 : i32
    %c0_i32_26 = arith.constant 0 : i32
    %48 = tpu.memref_slice %arg3[%47, %c0_i32_26] : memref<100x32xf32, #tpu.memory_space<any>> -> memref<1x32xf32, #tpu.memory_space<any>>
    %c6_i32_27 = arith.constant 6 : i32
    %c0_i32_28 = arith.constant 0 : i32
    %49 = tpu.memref_slice %arg6[%c6_i32_27, %c0_i32_28] : memref<8x32xf32, #tpu.memory_space<vmem>> -> memref<1x32xf32, #tpu.memory_space<vmem>>
    %50 = tpu.memref_slice %arg7[%c6_i32_25] : memref<8x!tpu.dma_semaphore, #tpu.memory_space<semaphore_mem>> -> memref<1x!tpu.dma_semaphore, #tpu.memory_space<semaphore_mem>>
    %51 = tpu.memref_squeeze %50 : memref<1x!tpu.dma_semaphore, #tpu.memory_space<semaphore_mem>> -> memref<!tpu.dma_semaphore, #tpu.memory_space<semaphore_mem>>
    tpu.enqueue_dma source(%48 : memref<1x32xf32, #tpu.memory_space<any>>) target(%49 : memref<1x32xf32, #tpu.memory_space<vmem>>) target_semaphore(%51 : memref<!tpu.dma_semaphore, #tpu.memory_space<semaphore_mem>>)
    %c7_i32 = arith.constant 7 : i32
    %52 = arith.addi %2, %c7_i32 : i32
    %53 = arith.index_cast %52 : i32 to index
    %54 = memref.load %arg2[%53] : memref<16xi32, #tpu.memory_space<smem>>
    %c7_i32_29 = arith.constant 7 : i32
    %c0_i32_30 = arith.constant 0 : i32
    %55 = tpu.memref_slice %arg3[%54, %c0_i32_30] : memref<100x32xf32, #tpu.memory_space<any>> -> memref<1x32xf32, #tpu.memory_space<any>>
    %c7_i32_31 = arith.constant 7 : i32
    %c0_i32_32 = arith.constant 0 : i32
    %56 = tpu.memref_slice %arg6[%c7_i32_31, %c0_i32_32] : memref<8x32xf32, #tpu.memory_space<vmem>> -> memref<1x32xf32, #tpu.memory_space<vmem>>
    %57 = tpu.memref_slice %arg7[%c7_i32_29] : memref<8x!tpu.dma_semaphore, #tpu.memory_space<semaphore_mem>> -> memref<1x!tpu.dma_semaphore, #tpu.memory_space<semaphore_mem>>
    %58 = tpu.memref_squeeze %57 : memref<1x!tpu.dma_semaphore, #tpu.memory_space<semaphore_mem>> -> memref<!tpu.dma_semaphore, #tpu.memory_space<semaphore_mem>>
    tpu.enqueue_dma source(%55 : memref<1x32xf32, #tpu.memory_space<any>>) target(%56 : memref<1x32xf32, #tpu.memory_space<vmem>>) target_semaphore(%58 : memref<!tpu.dma_semaphore, #tpu.memory_space<semaphore_mem>>)
    %c0_i32_33 = arith.constant 0 : i32
    %c0_i32_34 = arith.constant 0 : i32
    %c0_i32_35 = arith.constant 0 : i32
    %59 = tpu.memref_slice %arg3[%c0_i32_34, %c0_i32_35] : memref<100x32xf32, #tpu.memory_space<any>> -> memref<1x32xf32, #tpu.memory_space<any>>
    %c0_i32_36 = arith.constant 0 : i32
    %c0_i32_37 = arith.constant 0 : i32
    %60 = tpu.memref_slice %arg6[%c0_i32_36, %c0_i32_37] : memref<8x32xf32, #tpu.memory_space<vmem>> -> memref<1x32xf32, #tpu.memory_space<vmem>>
    %61 = tpu.memref_slice %arg7[%c0_i32_33] : memref<8x!tpu.dma_semaphore, #tpu.memory_space<semaphore_mem>> -> memref<1x!tpu.dma_semaphore, #tpu.memory_space<semaphore_mem>>
    %62 = tpu.memref_squeeze %61 : memref<1x!tpu.dma_semaphore, #tpu.memory_space<semaphore_mem>> -> memref<!tpu.dma_semaphore, #tpu.memory_space<semaphore_mem>>
    tpu.wait_dma2 semaphore(%62 : memref<!tpu.dma_semaphore, #tpu.memory_space<semaphore_mem>>) src(%59 : memref<1x32xf32, #tpu.memory_space<any>>) dst(%60 : memref<1x32xf32, #tpu.memory_space<vmem>>)
    %c1_i32_38 = arith.constant 1 : i32
    %c0_i32_39 = arith.constant 0 : i32
    %c0_i32_40 = arith.constant 0 : i32
    %63 = tpu.memref_slice %arg3[%c0_i32_39, %c0_i32_40] : memref<100x32xf32, #tpu.memory_space<any>> -> memref<1x32xf32, #tpu.memory_space<any>>
    %c1_i32_41 = arith.constant 1 : i32
    %c0_i32_42 = arith.constant 0 : i32
    %64 = tpu.memref_slice %arg6[%c1_i32_41, %c0_i32_42] : memref<8x32xf32, #tpu.memory_space<vmem>> -> memref<1x32xf32, #tpu.memory_space<vmem>>
    %65 = tpu.memref_slice %arg7[%c1_i32_38] : memref<8x!tpu.dma_semaphore, #tpu.memory_space<semaphore_mem>> -> memref<1x!tpu.dma_semaphore, #tpu.memory_space<semaphore_mem>>
    %66 = tpu.memref_squeeze %65 : memref<1x!tpu.dma_semaphore, #tpu.memory_space<semaphore_mem>> -> memref<!tpu.dma_semaphore, #tpu.memory_space<semaphore_mem>>
    tpu.wait_dma2 semaphore(%66 : memref<!tpu.dma_semaphore, #tpu.memory_space<semaphore_mem>>) src(%63 : memref<1x32xf32, #tpu.memory_space<any>>) dst(%64 : memref<1x32xf32, #tpu.memory_space<vmem>>)
    %c2_i32_43 = arith.constant 2 : i32
    %c0_i32_44 = arith.constant 0 : i32
    %c0_i32_45 = arith.constant 0 : i32
    %67 = tpu.memref_slice %arg3[%c0_i32_44, %c0_i32_45] : memref<100x32xf32, #tpu.memory_space<any>> -> memref<1x32xf32, #tpu.memory_space<any>>
    %c2_i32_46 = arith.constant 2 : i32
    %c0_i32_47 = arith.constant 0 : i32
    %68 = tpu.memref_slice %arg6[%c2_i32_46, %c0_i32_47] : memref<8x32xf32, #tpu.memory_space<vmem>> -> memref<1x32xf32, #tpu.memory_space<vmem>>
    %69 = tpu.memref_slice %arg7[%c2_i32_43] : memref<8x!tpu.dma_semaphore, #tpu.memory_space<semaphore_mem>> -> memref<1x!tpu.dma_semaphore, #tpu.memory_space<semaphore_mem>>
    %70 = tpu.memref_squeeze %69 : memref<1x!tpu.dma_semaphore, #tpu.memory_space<semaphore_mem>> -> memref<!tpu.dma_semaphore, #tpu.memory_space<semaphore_mem>>
    tpu.wait_dma2 semaphore(%70 : memref<!tpu.dma_semaphore, #tpu.memory_space<semaphore_mem>>) src(%67 : memref<1x32xf32, #tpu.memory_space<any>>) dst(%68 : memref<1x32xf32, #tpu.memory_space<vmem>>)
    %c3_i32_48 = arith.constant 3 : i32
    %c0_i32_49 = arith.constant 0 : i32
    %c0_i32_50 = arith.constant 0 : i32
    %71 = tpu.memref_slice %arg3[%c0_i32_49, %c0_i32_50] : memref<100x32xf32, #tpu.memory_space<any>> -> memref<1x32xf32, #tpu.memory_space<any>>
    %c3_i32_51 = arith.constant 3 : i32
    %c0_i32_52 = arith.constant 0 : i32
    %72 = tpu.memref_slice %arg6[%c3_i32_51, %c0_i32_52] : memref<8x32xf32, #tpu.memory_space<vmem>> -> memref<1x32xf32, #tpu.memory_space<vmem>>
    %73 = tpu.memref_slice %arg7[%c3_i32_48] : memref<8x!tpu.dma_semaphore, #tpu.memory_space<semaphore_mem>> -> memref<1x!tpu.dma_semaphore, #tpu.memory_space<semaphore_mem>>
    %74 = tpu.memref_squeeze %73 : memref<1x!tpu.dma_semaphore, #tpu.memory_space<semaphore_mem>> -> memref<!tpu.dma_semaphore, #tpu.memory_space<semaphore_mem>>
    tpu.wait_dma2 semaphore(%74 : memref<!tpu.dma_semaphore, #tpu.memory_space<semaphore_mem>>) src(%71 : memref<1x32xf32, #tpu.memory_space<any>>) dst(%72 : memref<1x32xf32, #tpu.memory_space<vmem>>)
    %c4_i32_53 = arith.constant 4 : i32
    %c0_i32_54 = arith.constant 0 : i32
    %c0_i32_55 = arith.constant 0 : i32
    %75 = tpu.memref_slice %arg3[%c0_i32_54, %c0_i32_55] : memref<100x32xf32, #tpu.memory_space<any>> -> memref<1x32xf32, #tpu.memory_space<any>>
    %c4_i32_56 = arith.constant 4 : i32
    %c0_i32_57 = arith.constant 0 : i32
    %76 = tpu.memref_slice %arg6[%c4_i32_56, %c0_i32_57] : memref<8x32xf32, #tpu.memory_space<vmem>> -> memref<1x32xf32, #tpu.memory_space<vmem>>
    %77 = tpu.memref_slice %arg7[%c4_i32_53] : memref<8x!tpu.dma_semaphore, #tpu.memory_space<semaphore_mem>> -> memref<1x!tpu.dma_semaphore, #tpu.memory_space<semaphore_mem>>
    %78 = tpu.memref_squeeze %77 : memref<1x!tpu.dma_semaphore, #tpu.memory_space<semaphore_mem>> -> memref<!tpu.dma_semaphore, #tpu.memory_space<semaphore_mem>>
    tpu.wait_dma2 semaphore(%78 : memref<!tpu.dma_semaphore, #tpu.memory_space<semaphore_mem>>) src(%75 : memref<1x32xf32, #tpu.memory_space<any>>) dst(%76 : memref<1x32xf32, #tpu.memory_space<vmem>>)
    %c5_i32_58 = arith.constant 5 : i32
    %c0_i32_59 = arith.constant 0 : i32
    %c0_i32_60 = arith.constant 0 : i32
    %79 = tpu.memref_slice %arg3[%c0_i32_59, %c0_i32_60] : memref<100x32xf32, #tpu.memory_space<any>> -> memref<1x32xf32, #tpu.memory_space<any>>
    %c5_i32_61 = arith.constant 5 : i32
    %c0_i32_62 = arith.constant 0 : i32
    %80 = tpu.memref_slice %arg6[%c5_i32_61, %c0_i32_62] : memref<8x32xf32, #tpu.memory_space<vmem>> -> memref<1x32xf32, #tpu.memory_space<vmem>>
    %81 = tpu.memref_slice %arg7[%c5_i32_58] : memref<8x!tpu.dma_semaphore, #tpu.memory_space<semaphore_mem>> -> memref<1x!tpu.dma_semaphore, #tpu.memory_space<semaphore_mem>>
    %82 = tpu.memref_squeeze %81 : memref<1x!tpu.dma_semaphore, #tpu.memory_space<semaphore_mem>> -> memref<!tpu.dma_semaphore, #tpu.memory_space<semaphore_mem>>
    tpu.wait_dma2 semaphore(%82 : memref<!tpu.dma_semaphore, #tpu.memory_space<semaphore_mem>>) src(%79 : memref<1x32xf32, #tpu.memory_space<any>>) dst(%80 : memref<1x32xf32, #tpu.memory_space<vmem>>)
    %c6_i32_63 = arith.constant 6 : i32
    %c0_i32_64 = arith.constant 0 : i32
    %c0_i32_65 = arith.constant 0 : i32
    %83 = tpu.memref_slice %arg3[%c0_i32_64, %c0_i32_65] : memref<100x32xf32, #tpu.memory_space<any>> -> memref<1x32xf32, #tpu.memory_space<any>>
    %c6_i32_66 = arith.constant 6 : i32
    %c0_i32_67 = arith.constant 0 : i32
    %84 = tpu.memref_slice %arg6[%c6_i32_66, %c0_i32_67] : memref<8x32xf32, #tpu.memory_space<vmem>> -> memref<1x32xf32, #tpu.memory_space<vmem>>
    %85 = tpu.memref_slice %arg7[%c6_i32_63] : memref<8x!tpu.dma_semaphore, #tpu.memory_space<semaphore_mem>> -> memref<1x!tpu.dma_semaphore, #tpu.memory_space<semaphore_mem>>
    %86 = tpu.memref_squeeze %85 : memref<1x!tpu.dma_semaphore, #tpu.memory_space<semaphore_mem>> -> memref<!tpu.dma_semaphore, #tpu.memory_space<semaphore_mem>>
    tpu.wait_dma2 semaphore(%86 : memref<!tpu.dma_semaphore, #tpu.memory_space<semaphore_mem>>) src(%83 : memref<1x32xf32, #tpu.memory_space<any>>) dst(%84 : memref<1x32xf32, #tpu.memory_space<vmem>>)
    %c7_i32_68 = arith.constant 7 : i32
    %c0_i32_69 = arith.constant 0 : i32
    %c0_i32_70 = arith.constant 0 : i32
    %87 = tpu.memref_slice %arg3[%c0_i32_69, %c0_i32_70] : memref<100x32xf32, #tpu.memory_space<any>> -> memref<1x32xf32, #tpu.memory_space<any>>
    %c7_i32_71 = arith.constant 7 : i32
    %c0_i32_72 = arith.constant 0 : i32
    %88 = tpu.memref_slice %arg6[%c7_i32_71, %c0_i32_72] : memref<8x32xf32, #tpu.memory_space<vmem>> -> memref<1x32xf32, #tpu.memory_space<vmem>>
    %89 = tpu.memref_slice %arg7[%c7_i32_68] : memref<8x!tpu.dma_semaphore, #tpu.memory_space<semaphore_mem>> -> memref<1x!tpu.dma_semaphore, #tpu.memory_space<semaphore_mem>>
    %90 = tpu.memref_squeeze %89 : memref<1x!tpu.dma_semaphore, #tpu.memory_space<semaphore_mem>> -> memref<!tpu.dma_semaphore, #tpu.memory_space<semaphore_mem>>
    tpu.wait_dma2 semaphore(%90 : memref<!tpu.dma_semaphore, #tpu.memory_space<semaphore_mem>>) src(%87 : memref<1x32xf32, #tpu.memory_space<any>>) dst(%88 : memref<1x32xf32, #tpu.memory_space<vmem>>)
    %c0 = arith.constant 0 : index
    %c0_73 = arith.constant 0 : index
    %91 = vector.load %arg6[%c0, %c0_73] : memref<8x32xf32, #tpu.memory_space<vmem>>, vector<8x32xf32>
    %c0_74 = arith.constant 0 : index
    %c0_75 = arith.constant 0 : index
    %92 = vector.load %arg4[%c0_74, %c0_75] : memref<8x32xf32, #tpu.memory_space<vmem>>, vector<8x32xf32>
    %93 = arith.addf %91, %92 : vector<8x32xf32>
    %c0_76 = arith.constant 0 : index
    %c0_77 = arith.constant 0 : index
    %94 = vector.load %arg5[%c0_76, %c0_77] : memref<8x32xf32, #tpu.memory_space<vmem>>, vector<8x32xf32>
    tpu.vector_store %arg5[%c0_76, %c0_77], %93 {strides = array<i32>} : memref<8x32xf32, #tpu.memory_space<vmem>>, vector<8x32xf32>,
    return
  }
  func.func @transform_1(%arg0: i32, %arg1: i32, %arg2: memref<16xi32, #tpu.memory_space<smem>>) -> (i32, i32) {
    %c0_i32 = arith.constant 0 : i32
    %c0_i32_0 = arith.constant 0 : i32
    return %arg1, %c0_i32 : i32, i32
  }
  func.func @transform_2(%arg0: i32, %arg1: i32, %arg2: memref<16xi32, #tpu.memory_space<smem>>) -> (i32, i32) {
    %c1_i32 = arith.constant 1 : i32
    %0 = arith.muli %arg0, %c1_i32 : i32
    %1 = arith.addi %0, %arg1 : i32
    %c0_i32 = arith.constant 0 : i32
    %c0_i32_0 = arith.constant 0 : i32
    return %1, %c0_i32 : i32, i32
  }
}

</mosaic_0001>

<bundles_post_ra>
// kernel: tpu_custom_call.1
= control target key start
LH: loop header
LB: loop body
LE: loop exit
PB: predicated region body
PF: predicated region fallthrough
CT: control target
= control target key end

     0   :  { %s1151_s0 = inlined_call_operand.vmem [shape: s32[16], index: 0, kind: input, shape index: {}]   ;;  %s1152_s1 = inlined_call_operand.vmem [shape: f32[100,32], index: 1, kind: input, shape index: {}]   ;;  %s1153_s2 = inlined_call_operand.vmem [shape: f32[8,32], index: 2, kind: input, shape index: {}]   ;;  %s1154_s3 = inlined_call_operand.hbm [shape: f32[16,32], index: 3, kind: output, shape index: {}]  }
   0x1   :  { %s8_s14 = sshll.u32 %s1151_s0, 4  ;;  %s9_s14 = int_to_ptr.vmem [resolvable:$true] %s8_s14 }
   0x2   :  { %s860_s15 = scalar_lea.vmem %s9_s14, 16  ;;  %p865_p1 = scmp.lt.s32.totalorder %s9_s14, %s9_s14 }
   0x3   :  { %p861_p0 = scmp.ne.s32.totalorder %s9_s14, %s860_s15  ;;  %p866_p2 = scmp.lt.s32.totalorder %s860_s15, %s860_s15 }
   0x5   :  { %p867_p3 = por %p866_p2, %p865_p1 }
   0x7   :  { %p868_p4 = pnand %p867_p3, %p861_p0 }
   0x9   :  { %871 = shalt.err (!%p868_p4)  }
   0xa   :  { %s970_s16 = smov [#allocation5]  }
   0xb   :  { %11 = dma.vmem_to_smem %s9_s14, 16, %s970_s16, [#allocation4] }
   0xc   :  { %924 = dma.done.wait [#allocation4], 16 }
   0xd   :  { %925 = vsyncadd [#allocation4], 4294967280 }
   0xe   :  { %13 = sfence }
   0xf   :  { %14 = vsyncpa [#allocation7], 0 }
  0x10   :  { %16 = vsyncpa [#allocation7 + $0x1], 0  ;;  %s995_s17 = smov 0   ;;  %s997_s18 = smov 0  }
  0x11   :  { %s999_s0 = smov 0   ;;  %s1001_s19 = smov 0  }
  0x12   :  { %s1003_s20 = smov 0   ;;  %s1005_s21 = smov 0  }
  0x13 LB: > { %s785_s22 = sadd.s32 4294967295, %s968_s21   ;;  %s786_s23 = sadd.s32 4294967294, %s968_s21   ;;  %s968_s21 = sphi %s1005_s21, %s22_s21   ;;  %s964_s20 = sphi %s1003_s20, %s1161_s20   ;;  %s960_s19 = sphi %s1001_s19, %s1160_s19   ;;  %s956_s0 = sphi %s999_s0, %s1159_s0   ;;  %s952_s18 = sphi %s997_s18, %s1158_s18   ;;  %s948_s17 = sphi %s995_s17, %s1157_s17  }
  0x14   : > { %s34_s24 = sadd.s32 1, %s964_s20  ;;  %s69_s25 = sadd.s32 1, %s956_s0 }
  0x15   : > { %p36_p5 = scmp.ge.s32.totalorder %s34_s24, 2  ;;  %p79_p6 = scmp.ne.s32.totalorder %s956_s0, %s952_s18 }
  0x16   : > { %p80_p7 = scmp.eq.s32.totalorder %s785_s22, 1  ;;  %p85_p8 = scmp.ne.s32.totalorder %s952_s18, %s948_s17 }
  0x17   : > { %s1163_s24 = smov (%p36_p5, %s34_s24), 0  ;;  %p86_p10 = scmp.eq.s32.totalorder %s786_s23, 1 }
  0x18   : > { %p1035_p9 = por %p80_p7, %p79_p6  ;;  %s66_s27 = ssub.s32 %s964_s20, %s1163_s24 }
  0x19   : > { %p789_p11 = scmp.ge.s32.totalorder %s968_s21, 1  ;;  %p67_p12 = scmp.eq.s32.totalorder %s66_s27, 0 }
  0x1a   : > { %p1042_p13 = por %p86_p10, %p85_p8  ;;  %p111_p0 = scmp.lt.s32.totalorder %s968_s21, 3 }
  0x1b   : > { %s1048_s29 = scalar_select %p67_p12, %s956_s0, %s69_s25  }
  0x1c   : > { %p112_p1 = pnand %p789_p11, %p111_p0 }
  0x1d   : > { %s127_s30 = sand.u32 (!%p112_p1), 1, %s952_s18   ;;  %s1052_s4 = sshll.u32 (!%p112_p1), %s960_s19, 3 }
  0x1e   : > { %115 = sbr.rel (%p112_p1) target bundleno = 150 (0x96), region = 24  ;;  %s1056_s5 = sshll.u32 (!%p112_p1), %s127_s30, 3 }
  0x1f   : > { %s138_s6 = sld [smem:[#allocation5 + %s1052_s4]] (!%p112_p1)  ;;  %s129_s10 = scalar_lea.vmem (!%p112_p1), [#allocation6], %s1056_s5 }
  0x25   : > { %s139_s9 = scalar_lea.vmem %s1152_s1, %s138_s6 }
  0x26   : > { %v157_v0 = vld [vmem:[%s139_s9] sm:$0x1] }
  0x27   : > { %158 = vst [vmem:[#allocation2] sm:$0x1] %v157_v0 }
  0x28   : > { %183 = vsyncadd [#allocation3], 16  ;;  %s184_s11 = sadd.s32 1, %s1052_s4 }
  0x29   : > { %s185_s12 = sld [smem:[#allocation5 + %s184_s11]] }
  0x2f   : > { %s186_s15 = scalar_lea.vmem %s1152_s1, %s185_s12 }
  0x30   : > { %v206_v1 = vld [vmem:[%s186_s15] sm:$0x1] }
  0x31   : > { %207 = vst [vmem:[#allocation2 + $0x1] sm:$0x1] %v206_v1 }
  0x32   : > { %232 = vsyncadd [#allocation3 + $0x1], 16  ;;  %s233_s16 = sadd.s32 2, %s1052_s4 }
  0x33   : > { %s234_s22 = sld [smem:[#allocation5 + %s233_s16]] }
  0x39   : > { %s235_s27 = scalar_lea.vmem %s1152_s1, %s234_s22 }
  0x3a   : > { %v255_v2 = vld [vmem:[%s235_s27] sm:$0x1] }
  0x3b   : > { %256 = vst [vmem:[#allocation2 + $0x2] sm:$0x1] %v255_v2 }
  0x3c   : > { %281 = vsyncadd [#allocation3 + $0x2], 16  ;;  %s282_s6 = sadd.s32 3, %s1052_s4 }
  0x3d   : > { %s283_s7 = sld [smem:[#allocation5 + %s282_s6]] }
  0x43   : > { %s284_s11 = scalar_lea.vmem %s1152_s1, %s283_s7 }
  0x44   : > { %v304_v3 = vld [vmem:[%s284_s11] sm:$0x1] }
  0x45   : > { %305 = vst [vmem:[#allocation2 + $0x3] sm:$0x1] %v304_v3 }
  0x46   : > { %330 = vsyncadd [#allocation3 + $0x3], 16  ;;  %s331_s12 = sadd.s32 4, %s1052_s4 }
  0x47   : > { %s332_s13 = sld [smem:[#allocation5 + %s331_s12]] }
  0x4d   : > { %s333_s16 = scalar_lea.vmem %s1152_s1, %s332_s13 }
  0x4e   : > { %v353_v4 = vld [vmem:[%s333_s16] sm:$0x1] }
  0x4f   : > { %354 = vst [vmem:[#allocation2 + $0x4] sm:$0x1] %v353_v4 }
  0x50   : > { %379 = vsyncadd [#allocation3 + $0x4], 16  ;;  %s380_s22 = sadd.s32 5, %s1052_s4 }
  0x51   : > { %s381_s23 = sld [smem:[#allocation5 + %s380_s22]] }
  0x57   : > { %s382_s6 = scalar_lea.vmem %s1152_s1, %s381_s23 }
  0x58   : > { %v402_v5 = vld [vmem:[%s382_s6] sm:$0x1] }
  0x59   : > { %403 = vst [vmem:[#allocation2 + $0x5] sm:$0x1] %v402_v5 }
  0x5a   : > { %428 = vsyncadd [#allocation3 + $0x5], 16  ;;  %s429_s7 = sadd.s32 6, %s1052_s4 }
  0x5b   : > { %s430_s8 = sld [smem:[#allocation5 + %s429_s7]] }
  0x61   : > { %s431_s12 = scalar_lea.vmem %s1152_s1, %s430_s8 }
  0x62   : > { %v451_v6 = vld [vmem:[%s431_s12] sm:$0x1] }
  0x63   : > { %452 = vst [vmem:[#allocation2 + $0x6] sm:$0x1] %v451_v6 }
  0x64   : > { %477 = vsyncadd [#allocation3 + $0x6], 16  ;;  %s478_s13 = sadd.s32 7, %s1052_s4 }
  0x65   : > { %s479_s14 = sld [smem:[#allocation5 + %s478_s13]] }
  0x6b   : > { %s480_s22 = scalar_lea.vmem %s1152_s1, %s479_s14 }
  0x6c   : > { %v500_v7 = vld [vmem:[%s480_s22] sm:$0x1] }
  0x6d   : > { %501 = vst [vmem:[#allocation2 + $0x7] sm:$0x1] %v500_v7 }
  0x6e   : > { %526 = vsyncadd [#allocation3 + $0x7], 16 }
  0x6f   : > { %926 = dma.done.wait [#allocation3], 16 }
  0x70   : > { %927 = vsyncadd [#allocation3], 4294967280 }
  0x71   : > { %928 = dma.done.wait [#allocation3 + $0x1], 16 }
  0x72   : > { %929 = vsyncadd [#allocation3 + $0x1], 4294967280 }
  0x73   : > { %930 = dma.done.wait [#allocation3 + $0x2], 16 }
  0x74   : > { %931 = vsyncadd [#allocation3 + $0x2], 4294967280 }
  0x75   : > { %932 = dma.done.wait [#allocation3 + $0x3], 16 }
  0x76   : > { %933 = vsyncadd [#allocation3 + $0x3], 4294967280 }
  0x77   : > { %934 = dma.done.wait [#allocation3 + $0x4], 16 }
  0x78   : > { %935 = vsyncadd [#allocation3 + $0x4], 4294967280 }
  0x79   : > { %936 = dma.done.wait [#allocation3 + $0x5], 16 }
  0x7a   : > { %937 = vsyncadd [#allocation3 + $0x5], 4294967280 }
  0x7b   : > { %938 = dma.done.wait [#allocation3 + $0x6], 16 }
  0x7c   : > { %939 = vsyncadd [#allocation3 + $0x6], 4294967280 }
  0x7d   : > { %940 = dma.done.wait [#allocation3 + $0x7], 16 }
  0x7e   : > { %941 = vsyncadd [#allocation3 + $0x7], 4294967280  ;;  %s793_s4 = sshll.u32 %s960_s19, 7  ;;  %s564_s23 = sshll.u32 %s129_s10, 4  ;;  %v544_v8 = vld [vmem:[#allocation2] sm:$0xff]  ;;  %vm547_vm0 = vcmask 261120   ;;  %s1102_s23 = int_to_ptr.vmem [resolvable:$true] %s564_s23 }
  0x7f   : > { %v545_v9 = vld [vmem:[%s1153_s2] sm:$0xff]  ;;  %s1100_s8 = scalar_lea.hbm %s1154_s3, %s793_s4  ;;  %s550_s19 = scalar_lea.sflag [#allocation7], %s127_s30 }
  0x80   : > { %v546_v10 = vadd.f32 %v545_v9, %v544_v8  ;;  %s872_s9 = scalar_lea.vmem %s1102_s23, 128  ;;  %s971_s11 = smov [#allocation6]  }
  0x81   : > { %p873_p2 = scmp.ne.s32.totalorder %s1102_s23, %s872_s9  ;;  %s876_s12 = sshll.u32 %s971_s11, 4  ;;  %s877_s12 = int_to_ptr.vmem [resolvable:$false] %s876_s12 }
  0x82   : > { %548 = vst.msk [vmem:[%s129_s10] sm:$0xff] %vm547_vm0, %v546_v10  ;;  %s878_s13 = scalar_lea.vmem %s877_s12, 256  ;;  %p879_p5 = scmp.lt.s32.totalorder %s1102_s23, %s877_s12 }
  0x83   : > { %p874_p3 = pnand %p873_p2, %p1035_p9  ;;  %p880_p6 = scmp.lt.s32.totalorder %s878_s13, %s872_s9 }
  0x85   : > { %p875_p4 = pneg %p874_p3  ;;  %p881_p7 = por %p880_p6, %p879_p5 }
  0x87   : > { %p882_p8 = pnand %p881_p7, %p875_p4 }
  0x89   : > { %885 = shalt.err (!%p882_p8)
}
  0x8a   : > { %s886_s30 = scalar_lea.hbm %s1100_s8, 128  ;;  %s890_s14 = scalar_lea.hbm %s1154_s3, 256 }
  0x8b   : > { %p887_p10 = scmp.ne.s32.totalorder %s1100_s8, %s886_s30  ;;  %p891_p0 = scmp.lt.u32.totalorder %s1100_s8, %s1154_s3 }
  0x8c   : > { %p892_p1 = scmp.lt.u32.totalorder %s890_s14, %s886_s30  ;;  %p894_p3 = scmp.lt.u32.totalorder %s886_s30, %s1100_s8 }
  0x8d   : > { %p888_p11 = pnand %p887_p10, %p1035_p9 }
  0x8e   : > { %p893_p2 = por %p892_p1, %p891_p0 }
  0x8f   : > { %p889_p12 = pneg %p888_p11 }
  0x90   : > { %p895_p4 = por %p894_p3, %p893_p2 }
  0x92   : > { %p896_p5 = pnand %p895_p4, %p889_p12 }
  0x94   : > { %899 = shalt.err (!%p896_p5)
}
  0x95   : > { %804 = dma.vmem_to_hbm [thread:$0]  (%p1035_p9), %s1102_s23, 128, %s1100_s8, %s550_s19  }
  0x96 PF: > { %p810_p6 = scmp.ge.s32.totalorder %s968_s21, 2  ;;  %s576_s22 = sand.u32 1, %s948_s17  }
  0x97   : > { %s577_s4 = scalar_lea.sflag [#allocation7], %s576_s22 }
  0x98   : > { %p807_p7 = pnand %p810_p6, %p1042_p13 }
  0x9a   : > { %943 = dma.done.wait (!%p807_p7), %s577_s4, 128  }
  0x9b   : > { %945 = vsyncadd (!%p807_p7), %s577_s4, 4294967168  ;;  %s22_s21 = sadd.s32 1, %s968_s21   ;;  %s1157_s17 = smov %s952_s18 }
  0x9c   : > { %p19_p8 = scmp.ge.s32.totalorder %s22_s21, 4   ;;  %s1158_s18 = smov %s956_s0 }
  0x9d   : > { %s1159_s0 = smov %s1048_s29  ;;  %s1160_s19 = smov %s964_s20 }
  0x9e   : > { %s1161_s20 = smov %s1163_s24  ;;  %21 = sbr.rel (!%p19_p8) target bundleno = 19 (0x13), region = 408 }
  0xa5   :  { %582 = vsyncpa [#allocation7], 1 }
  0xa6   :  { %584 = vsyncpa [#allocation7 + $0x1], 1 }
  0xa7   :  { %585 = vsyncmov [#allocation3] }
  0xaa   :  { %s586_s26 = vpop.sfrf %585 }
  0xab   :  { %p796_p9 = scmp.ne.s32.totalorder %s586_s26, 0 }
  0xad   :  { %590 = shalt.err (%p796_p9)  }
  0xae   :  { %592 = vsyncmov [#allocation3 + $0x1] }
  0xb1   :  { %s593_s28 = vpop.sfrf %592 }
  0xb2   :  { %p797_p13 = scmp.ne.s32.totalorder %s593_s28, 0 }
  0xb4   :  { %597 = shalt.err (%p797_p13)  }
  0xb5   :  { %599 = vsyncmov [#allocation3 + $0x2] }
  0xb8   :  { %s600_s23 = vpop.sfrf %599 }
  0xb9   :  { %p798_p10 = scmp.ne.s32.totalorder %s600_s23, 0 }
  0xbb   :  { %604 = shalt.err (%p798_p10)  }
  0xbc   :  { %606 = vsyncmov [#allocation3 + $0x3] }
  0xbf   :  { %s607_s29 = vpop.sfrf %606 }
  0xc0   :  { %p799_p11 = scmp.ne.s32.totalorder %s607_s29, 0 }
  0xc2   :  { %611 = shalt.err (%p799_p11)  }
  0xc3   :  { %613 = vsyncmov [#allocation3 + $0x4] }
  0xc6   :  { %s614_s21 = vpop.sfrf %613 }
  0xc7   :  { %p800_p12 = scmp.ne.s32.totalorder %s614_s21, 0 }
  0xc9   :  { %618 = shalt.err (%p800_p12)  }
  0xca   :  { %620 = vsyncmov [#allocation3 + $0x5] }
  0xcd   :  { %s621_s1 = vpop.sfrf %620 }
  0xce   :  { %p801_p0 = scmp.ne.s32.totalorder %s621_s1, 0 }
  0xd0   :  { %625 = shalt.err (%p801_p0)  }
  0xd1   :  { %627 = vsyncmov [#allocation3 + $0x6] }
  0xd4   :  { %s628_s2 = vpop.sfrf %627 }
  0xd5   :  { %p802_p1 = scmp.ne.s32.totalorder %s628_s2, 0 }
  0xd7   :  { %632 = shalt.err (%p802_p1)  }
  0xd8   :  { %634 = vsyncmov [#allocation3 + $0x7] }
  0xdb   :  { %s635_s3 = vpop.sfrf %634 }
  0xdc   :  { %p803_p2 = scmp.ne.s32.totalorder %s635_s3, 0 }
  0xde   :  { %639 = shalt.err (%p803_p2)  }

</bundles_post_ra>
